<compile_context>
chip_gen: v7x
topology: tpu7x:2x2x1
jax: 0.10.0
libtpu: 0.0.40
codegen_flags: <defaults>
</compile_context>

<pallas_src>
import functools

import jax
import jax.numpy as jnp
from jax.experimental import pallas as pl
from jax.experimental.pallas import tpu as pltpu

LANES = 128


def ceo_loss_kernel(x_ref, y_ref, out_ref, *, num_classes, batch_size, tile_rows):
    # x_ref: (tr, 128) f32, y_ref: (tr, 128) bf16 (exact for labels < 256)
    # out_ref: (1, 128) f32 per-tile partial sum (lane-dense)
    x = x_ref[...]
    y = y_ref[...].astype(jnp.float32)

    # Clamp to [0, C-1]: exact (per-sample loss is constant in x outside the
    # level range), and it bounds all logits to [-(C-1), 0] so the logsumexp
    # needs no max shift and cannot under/overflow.
    xc = jnp.clip(x, 0.0, jnp.float32(num_classes - 1))

    # Fused, unrolled sum_j exp(-|x - j|): 4 VALU + 1 EUP op per class.
    s = jnp.exp(-jnp.abs(xc))                              # j = 0
    for j in range(1, num_classes):
        s = s + jnp.exp(-jnp.abs(xc - jnp.float32(j)))

    # per-sample loss = logsumexp_j(-|x-j|) - (-|x-y|) = log(s) + |x-y|
    # (both terms use the clamped x; the shift cancels exactly).
    per_sample = jnp.log(s) + jnp.abs(xc - y)              # (tr, 128)

    tile = pl.program_id(0)
    is_last = tile == pl.num_programs(0) - 1

    @pl.when(jnp.logical_not(is_last))
    def _():
        # Hot path: no masking — padding only ever lives in the last tile.
        out_ref[...] = jnp.sum(per_sample, axis=0, keepdims=True)

    @pl.when(is_last)
    def _():
        # Only the last tile contains batch padding; mask it here so all
        # other tiles pay no per-element masking cost.
        row = jax.lax.broadcasted_iota(jnp.int32, per_sample.shape, 0)
        lane = jax.lax.broadcasted_iota(jnp.int32, per_sample.shape, 1)
        # int32 flat index: fine for padded totals < 2^31 samples.
        flat = (tile * tile_rows + row) * LANES + lane
        masked = jnp.where(flat < batch_size, per_sample, 0.0)
        out_ref[...] = jnp.sum(masked, axis=0, keepdims=True)


def ceo_loss(x, y, num_classes=4, tile_rows=2048):
    """x: (B,) float, y: (B,) int in [0, num_classes) -> scalar f32 CEO loss."""
    B = x.shape[0]
    rows = pl.cdiv(B, LANES)
    if rows < 16:
        # Single tile; block == full array so the (8,128) rule is satisfied.
        tr = rows
        num_tiles = 1
    else:
        # At least two grid steps (lets v7x's second TensorCore work) with a
        # tile row count that is a multiple of 8 and capped for VMEM.
        tr = min(tile_rows, (pl.cdiv(rows, 2) // 8) * 8)
        num_tiles = pl.cdiv(rows, tr)
    rows_padded = num_tiles * tr
    total = rows_padded * LANES

    xf = x.astype(jnp.float32)
    x_pad = jnp.pad(xf, (0, total - B)).reshape(rows_padded, LANES)
    # Labels as bf16: exact for integer labels < 256, halves label HBM bytes.
    yb = y.astype(jnp.bfloat16)
    y_pad = jnp.pad(yb, (0, total - B)).reshape(rows_padded, LANES)

    kernel = functools.partial(
        ceo_loss_kernel, num_classes=num_classes, batch_size=B, tile_rows=tr)

    cost = pl.CostEstimate(
        flops=30 * total,
        transcendentals=(num_classes + 1) * total,
        bytes_accessed=6 * total + num_tiles * LANES * 4)

    partial_sums = pl.pallas_call(
        kernel,
        out_shape=jax.ShapeDtypeStruct((num_tiles, LANES), jnp.float32),
        grid=(num_tiles,),
        in_specs=[
            pl.BlockSpec((tr, LANES), lambda i: (i, 0)),
            pl.BlockSpec((tr, LANES), lambda i: (i, 0)),
        ],
        out_specs=pl.BlockSpec((1, LANES), lambda i: (i, 0)),
        compiler_params=pltpu.CompilerParams(
            dimension_semantics=("parallel",)),
        cost_estimate=cost,
    )(x_pad, y_pad)

    # Final reduction of the lane-dense partials in plain JAX; divide by the
    # true batch size (padding was masked out in the last tile).
    return jnp.sum(partial_sums) / jnp.float32(B)


def _ceo_loss_ref(x, y, num_classes=4):
    # pure-JAX reference for validation
    levels = jnp.arange(num_classes, dtype=jnp.float32)[None, :]
    neg_logit = -jnp.abs(x.astype(jnp.float32)[:, None] - levels)
    lse = jax.scipy.special.logsumexp(neg_logit, axis=1)
    picked = jnp.take_along_axis(
        neg_logit, y[:, None].astype(jnp.int32), axis=1)[:, 0]
    return jnp.mean(lse - picked)


if __name__ == "__main__":
    num_classes = 4
    key = jax.random.PRNGKey(0)

    # Small shapes consistent with the module's (B,) inputs; the 4100 case
    # exercises the multi-tile path plus last-tile padding mask, and the
    # second case exercises out-of-range regression values (clamp path).
    for B, lo, hi in ((8, 0.0, 3.0), (300, -2.0, 5.0), (4100, 0.0, 3.0)):
        key, kx, ky = jax.random.split(key, 3)
        x = jax.random.uniform(kx, (B,), jnp.float32, minval=lo, maxval=hi)
        y = jax.random.randint(ky, (B,), 0, num_classes, dtype=jnp.int32)

        loss = ceo_loss(x, y, num_classes=num_classes)
        jax.block_until_ready(loss)

        ref = _ceo_loss_ref(x, y, num_classes=num_classes)
        assert jnp.allclose(loss, ref, atol=1e-5, rtol=1e-5), (B, loss, ref)

    print("KERNEL_OK")
</pallas_src>

<mosaic_0001>
module attributes {stable_mosaic.version = 11 : i64} {
  func.func @ceo_loss_kernel(%arg0: i32, %arg1: memref<1x128xf32, #tpu.memory_space<vmem>>, %arg2: memref<1x128xbf16, #tpu.memory_space<vmem>>, %arg3: memref<1x128xf32, #tpu.memory_space<vmem>>) attributes {dimension_semantics = [#tpu.dimension_semantics<parallel>], iteration_bounds = array<i64: 1>, scalar_prefetch = 0 : i64, scratch_operands = 0 : i64, tpu.core_type = #tpu.core_type<tc>, window_params = [{transform_indices = @transform_0, window_bounds = array<i64: 1, 128>}, {transform_indices = @transform_1, window_bounds = array<i64: 1, 128>}, {transform_indices = @transform_2, window_bounds = array<i64: 1, 128>}]} {
    %c0 = arith.constant 0 : index
    %c0_0 = arith.constant 0 : index
    %0 = vector.load %arg1[%c0, %c0_0] : memref<1x128xf32, #tpu.memory_space<vmem>>, vector<1x128xf32>
    %c0_1 = arith.constant 0 : index
    %c0_2 = arith.constant 0 : index
    %1 = vector.load %arg2[%c0_1, %c0_2] : memref<1x128xbf16, #tpu.memory_space<vmem>>, vector<1x128xbf16>
    %2 = arith.extf %1 : vector<1x128xbf16> to vector<1x128xf32>
    %cst = arith.constant 0.000000e+00 : f32
    %cst_3 = arith.constant 3.000000e+00 : f32
    %3 = vector.broadcast %cst : f32 to vector<1x128xf32>
    %4 = arith.maximumf %3, %0 : vector<1x128xf32>
    %5 = vector.broadcast %cst_3 : f32 to vector<1x128xf32>
    %6 = arith.minimumf %5, %4 : vector<1x128xf32>
    %7 = math.absf %6 : vector<1x128xf32>
    %cst_4 = arith.constant 0.000000e+00 : f32
    %8 = vector.broadcast %cst_4 : f32 to vector<1x128xf32>
    %9 = arith.subf %8, %7 : vector<1x128xf32>
    %10 = math.exp %9 : vector<1x128xf32>
    %cst_5 = arith.constant 1.000000e+00 : f32
    %11 = vector.broadcast %cst_5 : f32 to vector<1x128xf32>
    %12 = arith.subf %6, %11 : vector<1x128xf32>
    %13 = math.absf %12 : vector<1x128xf32>
    %cst_6 = arith.constant 0.000000e+00 : f32
    %14 = vector.broadcast %cst_6 : f32 to vector<1x128xf32>
    %15 = arith.subf %14, %13 : vector<1x128xf32>
    %16 = math.exp %15 : vector<1x128xf32>
    %17 = arith.addf %10, %16 : vector<1x128xf32>
    %cst_7 = arith.constant 2.000000e+00 : f32
    %18 = vector.broadcast %cst_7 : f32 to vector<1x128xf32>
    %19 = arith.subf %6, %18 : vector<1x128xf32>
    %20 = math.absf %19 : vector<1x128xf32>
    %cst_8 = arith.constant 0.000000e+00 : f32
    %21 = vector.broadcast %cst_8 : f32 to vector<1x128xf32>
    %22 = arith.subf %21, %20 : vector<1x128xf32>
    %23 = math.exp %22 : vector<1x128xf32>
    %24 = arith.addf %17, %23 : vector<1x128xf32>
    %cst_9 = arith.constant 3.000000e+00 : f32
    %25 = vector.broadcast %cst_9 : f32 to vector<1x128xf32>
    %26 = arith.subf %6, %25 : vector<1x128xf32>
    %27 = math.absf %26 : vector<1x128xf32>
    %cst_10 = arith.constant 0.000000e+00 : f32
    %28 = vector.broadcast %cst_10 : f32 to vector<1x128xf32>
    %29 = arith.subf %28, %27 : vector<1x128xf32>
    %30 = math.exp %29 : vector<1x128xf32>
    %31 = arith.addf %24, %30 : vector<1x128xf32>
    %32 = math.log %31 : vector<1x128xf32>
    %33 = arith.subf %6, %2 : vector<1x128xf32>
    %34 = math.absf %33 : vector<1x128xf32>
    %35 = arith.addf %32, %34 : vector<1x128xf32>
    %c0_i32 = arith.constant 0 : i32
    %36 = arith.cmpi eq, %arg0, %c0_i32 : i32
    %true = arith.constant true
    %37 = arith.xori %36, %true : i1
    %38 = arith.extui %37 : i1 to i32
    %c0_i32_11 = arith.constant 0 : i32
    %39 = arith.cmpi ne, %38, %c0_i32_11 : i32
    scf.if %39 {
      %cst_13 = arith.constant dense<0.000000e+00> : vector<128xf32>
      %42 = vector.multi_reduction <add>, %35, %cst_13 [0] : vector<1x128xf32> to vector<128xf32>
      %43 = vector.shape_cast %42 : vector<128xf32> to vector<1x128xf32>
      %c0_14 = arith.constant 0 : index
      %c0_15 = arith.constant 0 : index
      %44 = vector.load %arg3[%c0_14, %c0_15] : memref<1x128xf32, #tpu.memory_space<vmem>>, vector<1x128xf32>
      tpu.vector_store %arg3[%c0_14, %c0_15], %43 {strides = array<i32>} : memref<1x128xf32, #tpu.memory_space<vmem>>, vector<1x128xf32>,
    } else {
    }
    %40 = arith.extui %36 : i1 to i32
    %c0_i32_12 = arith.constant 0 : i32
    %41 = arith.cmpi ne, %40, %c0_i32_12 : i32
    scf.if %41 {
      %42 = tpu.iota {dimensions = array<i32: 0>} : vector<1x128xi32>
      %43 = tpu.iota {dimensions = array<i32: 1>} : vector<1x128xi32>
      %c1_i32 = arith.constant 1 : i32
      %44 = arith.muli %arg0, %c1_i32 : i32
      %45 = vector.broadcast %44 : i32 to vector<1x128xi32>
      %46 = arith.addi %45, %42 : vector<1x128xi32>
      %c128_i32 = arith.constant 128 : i32
      %47 = vector.broadcast %c128_i32 : i32 to vector<1x128xi32>
      %48 = arith.muli %46, %47 : vector<1x128xi32>
      %49 = arith.addi %48, %43 : vector<1x128xi32>
      %c8_i32 = arith.constant 8 : i32
      %50 = vector.broadcast %c8_i32 : i32 to vector<1x128xi32>
      %51 = arith.cmpi slt, %49, %50 : vector<1x128xi32>
      %cst_13 = arith.constant 0.000000e+00 : f32
      %52 = vector.broadcast %cst_13 : f32 to vector<1x128xf32>
      %53 = arith.select %51, %35, %52 : vector<1x128xi1>, vector<1x128xf32>
      %cst_14 = arith.constant dense<0.000000e+00> : vector<128xf32>
      %54 = vector.multi_reduction <add>, %53, %cst_14 [0] : vector<1x128xf32> to vector<128xf32>
      %55 = vector.shape_cast %54 : vector<128xf32> to vector<1x128xf32>
      %c0_15 = arith.constant 0 : index
      %c0_16 = arith.constant 0 : index
      %56 = vector.load %arg3[%c0_15, %c0_16] : memref<1x128xf32, #tpu.memory_space<vmem>>, vector<1x128xf32>
      tpu.vector_store %arg3[%c0_15, %c0_16], %55 {strides = array<i32>} : memref<1x128xf32, #tpu.memory_space<vmem>>, vector<1x128xf32>,
    } else {
    }
    return
  }
  func.func @transform_0(%arg0: i32) -> (i32, i32) {
    %c0_i32 = arith.constant 0 : i32
    %c0_i32_0 = arith.constant 0 : i32
    return %arg0, %c0_i32 : i32, i32
  }
  func.func @transform_1(%arg0: i32) -> (i32, i32) {
    %c0_i32 = arith.constant 0 : i32
    %c0_i32_0 = arith.constant 0 : i32
    return %arg0, %c0_i32 : i32, i32
  }
  func.func @transform_2(%arg0: i32) -> (i32, i32) {
    %c0_i32 = arith.constant 0 : i32
    %c0_i32_0 = arith.constant 0 : i32
    return %arg0, %c0_i32 : i32, i32
  }
}

</mosaic_0001>

<bundles_post_ra>
// kernel: tpu_custom_call.1
= control target key start
LH: loop header
LB: loop body
LE: loop exit
PB: predicated region body
PF: predicated region fallthrough
CT: control target
= control target key end

     0   :  { %7 = vsyncpa [#allocation3], 0  ;;  %s200_s0 = inlined_call_operand.hbm [shape: f32[1,128], index: 0, kind: input, shape index: {}]   ;;  %s201_s1 = inlined_call_operand.vmem [shape: bf16[1,128], index: 1, kind: input, shape index: {}]   ;;  %s202_s2 = inlined_call_operand.hbm [shape: f32[1,128], index: 2, kind: output, shape index: {}]  }
   0x1   :  { %8 = vsyncpa [#allocation4], 0  ;;  %s156_s9 = smov [#allocation2]   ;;  %s108_s13 = scalar_lea.hbm %s200_s0, 16 }
   0x2   :  { %s15_s10 = sshll.u32 %s156_s9, 4  ;;  %p109_p0 = scmp.ne.s32.totalorder %s200_s0, %s108_s13  ;;  %s16_s10 = int_to_ptr.vmem [resolvable:$true] %s15_s10 }
   0x3   :  { %p112_p1 = scmp.lt.u32.totalorder %s108_s13, %s200_s0 }
   0x5   :  { %p114_p2 = pnand %p112_p1, %p109_p0 }
   0x7   :  { %117 = shalt.err (!%p114_p2)
}
   0x8   :  { %s118_s18 = scalar_lea.vmem %s16_s10, 16  ;;  %s122_s19 = scalar_lea.vmem %s16_s10, 32 }
   0x9   :  { %p119_p3 = scmp.ne.s32.totalorder %s16_s10, %s118_s18  ;;  %p123_p4 = scmp.lt.s32.totalorder %s16_s10, %s16_s10 }
   0xa   :  { %p124_p5 = scmp.lt.s32.totalorder %s122_s19, %s118_s18 }
   0xc   :  { %p125_p6 = por %p124_p5, %p123_p4 }
   0xe   :  { %p126_p7 = pnand %p125_p6, %p119_p3 }
  0x10   :  { %129 = shalt.err (!%p126_p7)
}
  0x11   :  { %18 = dma.hbm_to_vmem [thread:$0]  %s200_s0, 16, %s16_s10, [#allocation3]  }
  0x12   :  { %152 = dma.done.wait [#allocation3], 16  }
  0x13   :  { %153 = vsyncadd [#allocation3], 4294967280  ;;  %v24_v0 = vld [vmem:[#allocation2] sm:$0x1]  ;;  %v66_v24 = vlaneseq  ;;  %s157_s23 = smov [#allocation5]  }
  0x14   :  { %v27_v1 = vmax.f32 %v24_v0, 0.0  ;;  %v25_v25 = vld [vmem:[%s201_s1] sm:$0x1]  ;;  %s84_s24 = sshll.u32 %s157_s23, 4  ;;  %s85_s24 = int_to_ptr.vmem [resolvable:$true] %s84_s24 }
  0x15   :  { %v67_v27 = vshrl.u32 %v66_v24, 7  ;;  %v26_v28 = vunpack.c.l.bf16 %v25_v25  ;;  %v69_v29 = vand.u32 127, %v66_v24  ;;  %s130_s25 = scalar_lea.vmem %s85_s24, 16  ;;  %s134_s1 = scalar_lea.vmem %s85_s24, 32 }
  0x16   :  { %v28_v2 = vmin.f32 %v27_v1, 3.0  ;;  %p131_p8 = scmp.ne.s32.totalorder %s85_s24, %s130_s25  ;;  %p135_p9 = scmp.lt.s32.totalorder %s85_s24, %s85_s24 }
  0x17   :  { %v72_v30 = vmul.u32 128, %v67_v27  ;;  %p136_p10 = scmp.lt.s32.totalorder %s134_s1, %s130_s25 }
  0x18   :  { %v29_v3 = vand.u32 2147483647, %v28_v2  ;;  %v93_v4 = vadd.f32 -1.0, %v28_v2  ;;  %v94_v5 = vadd.f32 -2.0, %v28_v2  ;;  %v95_v6 = vadd.f32 -3.0, %v28_v2 }
  0x19   :  { %v53_v31 = vsub.f32 %v28_v2, %v26_v28  ;;  %v73_v32 = vadd.s32 %v72_v30, %v69_v29  ;;  %p137_p11 = por %p136_p10, %p135_p9 }
  0x1a   :  { %v30_v7 = vsub.f32 0.0, %v29_v3  ;;  %v34_v8 = vand.u32 2147483647, %v93_v4  ;;  %v40_v9 = vand.u32 2147483647, %v94_v5 }
  0x1b   :  { %v46_v10 = vand.u32 2147483647, %v95_v6  ;;  %v54_v33 = vand.u32 2147483647, %v53_v31  ;;  %vm74_vm0 = vcmp.lt.s32.totalorder %v73_v32, 8  ;;  %p138_p12 = pnand %p137_p11, %p131_p8 }
  0x1c   :  { %v31_v11 = vmul.f32 1.442695, %v30_v7  ;;  %v35_v12 = vsub.f32 0.0, %v34_v8  ;;  %v41_v13 = vsub.f32 0.0, %v40_v9 }
  0x1d   :  { %v47_v14 = vsub.f32 0.0, %v46_v10 }
  0x1e   :  { %98 = vpow2.f32 %v31_v11  ;;  %v36_v15 = vmul.f32 1.442695, %v35_v12  ;;  %v42_v16 = vmul.f32 1.442695, %v41_v13 }
  0x1f   :  { %v48_v17 = vmul.f32 1.442695, %v47_v14 }
  0x20   :  { %100 = vpow2.f32 %v36_v15 }
  0x21   :  { %102 = vpow2.f32 %v42_v16 }
  0x22   :  { %104 = vpow2.f32 %v48_v17 }
  0x28   :  { %v99_v18 = vpop.eup %98 }
  0x2a   :  { %v101_v19 = vpop.eup %100 }
  0x2b   :  { %v103_v20 = vpop.eup %102  ;;  %v38_v21 = vadd.f32 %v101_v19, %v99_v18 }
  0x2c   :  { %v105_v22 = vpop.eup %104 }
  0x2d   :  { %v44_v23 = vadd.f32 %v103_v20, %v38_v21 }
  0x2f   :  { %v50_v26 = vadd.f32 %v105_v22, %v44_v23 }
  0x31   :  { %106 = vlog2.f32 %v50_v26 }
  0x3b   :  { %v107_v34 = vpop.eup %106 }
  0x3c   :  { %v52_v35 = vmul.f32 0.6931472, %v107_v34 }
  0x3e   :  { %v55_v36 = vadd.f32 %v54_v33, %v52_v35 }
  0x40   :  { %v75_v37 = vsel %vm74_vm0, %v55_v36, 0.0 }
  0x41   :  { %77 = vst [vmem:[#allocation5] sm:$0x1] %v75_v37 }
  0x42   :  { %141 = shalt.err (!%p138_p12)
}
  0x43   :  { %s142_s28 = scalar_lea.hbm %s202_s2, 16 }
  0x44   :  { %p143_p13 = scmp.ne.s32.totalorder %s202_s2, %s142_s28  ;;  %p146_p0 = scmp.lt.u32.totalorder %s142_s28, %s202_s2 }
  0x46   :  { %p148_p1 = pnand %p146_p0, %p143_p13 }
  0x48   :  { %151 = shalt.err (!%p148_p1)
}
  0x49   :  { %87 = dma.vmem_to_hbm [thread:$0]  %s85_s24, 16, %s202_s2, [#allocation4]  }
  0x4a   :  { %154 = dma.done.wait [#allocation4], 16  }
  0x4b   :  { %155 = vsyncadd [#allocation4], 4294967280 }
  0x4c   :  { %91 = vsyncpa [#allocation3], 1 }
  0x4d   :  { %92 = vsyncpa [#allocation4], 1 }

</bundles_post_ra>
